<compile_context>
chip_gen: v7x
topology: tpu7x:2x2x1
jax: 0.10.0
libtpu: 0.0.40
codegen_flags: <defaults>
</compile_context>

<pallas_src>
import jax
import jax.numpy as jnp
from jax.experimental import pallas as pl
from jax.experimental.pallas import tpu as pltpu


def _b1relu_kernel(x_ref, bias_ref, o_ref):
    # x_ref: (BN, W) row-block tile; bias_ref: (1, W) VMEM-resident block
    # (constant index_map -> fetched once).  Pure VPU elementwise; mem-bound.
    x = x_ref[...].astype(jnp.float32)
    b = bias_ref[...].astype(jnp.float32)
    o_ref[...] = jnp.maximum(x + b, 0.0).astype(o_ref.dtype)


def _sublane_multiple(dtype):
    """Minimum second-minor alignment for packed dtypes (8/16/32 sublanes)."""
    itemsize = jnp.dtype(dtype).itemsize
    if itemsize >= 4:
        return 8
    if itemsize == 2:
        return 16
    return 32


def _choose_block_rows(n_rows, row_bytes, dtype,
                       target_tile_bytes=2 << 20,
                       min_tile_bytes=1 << 20,
                       min_steps=8):
    """Rows per block: ~1-2 MiB tiles, >= ~8 grid steps, dtype-aligned sublanes."""
    bn = max(1, target_tile_bytes // row_bytes)
    # Aim for >= min_steps grid steps so double-buffering has DMA/compute to
    # overlap, and so v7x megacore gets several steps per TensorCore.
    bn = min(bn, max(1, pl.cdiv(n_rows, min_steps)))
    # ...but don't shrink tiles below ~1 MiB; 1-4 MiB tiles already sit at
    # 85%+ of the measured HBM roofline, smaller ones pay per-step overhead.
    if bn * row_bytes < min_tile_bytes:
        bn = max(bn, min(n_rows, max(1, min_tile_bytes // row_bytes)))
    bn = min(bn, n_rows)
    if bn < n_rows:
        align = _sublane_multiple(dtype)
        aligned = (bn // align) * align
        bn = n_rows if (aligned == 0 or aligned >= n_rows) else aligned
    return bn


def b1relu(x, bias):
    """relu(bias + x) with bias of shape (1, 1, D) broadcast over (N, C)."""
    n, c, d = x.shape
    assert bias.shape == (1, 1, d)

    w = c * d
    # Lane-dense 2D view of x; tile bias along C so broadcast semantics match:
    # x2[i, c*D + k] = x[i, c, k],  bias2[0, c*D + k] = bias[0, 0, k].
    x2 = x.reshape(n, w)
    bias2 = jnp.tile(bias.reshape(1, d), (1, c))

    # Lane-density guard: pad the flattened width to a multiple of 128 so the
    # output stores stay unmasked full-width vst (biggest measured lever).
    w_pad = ((w + 127) // 128) * 128
    if w_pad != w:
        x2 = jnp.pad(x2, ((0, 0), (0, w_pad - w)))
        bias2 = jnp.pad(bias2, ((0, 0), (0, w_pad - w)))

    bn = _choose_block_rows(n, w_pad * x2.dtype.itemsize, x2.dtype)
    grid = (pl.cdiv(n, bn),)

    out2 = pl.pallas_call(
        _b1relu_kernel,
        out_shape=jax.ShapeDtypeStruct((n, w_pad), x.dtype),
        grid_spec=pltpu.PrefetchScalarGridSpec(
            num_scalar_prefetch=0,
            grid=grid,
            in_specs=[
                pl.BlockSpec((bn, w_pad), lambda i: (i, 0)),  # x row-block
                pl.BlockSpec((1, w_pad), lambda i: (0, 0)),   # bias: one DMA, reused
            ],
            out_specs=pl.BlockSpec((bn, w_pad), lambda i: (i, 0)),
        ),
        compiler_params=pltpu.CompilerParams(
            # Row axis is independent -> shard across cores on megacore parts.
            # On v7x, confirm via trace that both TCs get steps; if not,
            # switch to pltpu.CORE_PARALLEL.
            dimension_semantics=("parallel",),
        ),
    )(x2, bias2)

    if w_pad != w:
        out2 = out2[:, :w]
    return out2.reshape(n, c, d)


if __name__ == "__main__":
    # Small shapes consistent with the module: x (N, C, D), bias_shape = D.
    batch, chans, bias_shape = 4, 16, 32

    key = jax.random.PRNGKey(0)
    x = jax.random.normal(key, (batch, chans, bias_shape), dtype=jnp.float32)

    # Deterministic parameter init matching nn.init.zeros_(self.bias).
    bias = jnp.zeros((1, 1, bias_shape), dtype=jnp.float32)

    out = b1relu(x, bias)
    out = jax.block_until_ready(out)

    # Sanity check against pure-JAX reference.
    ref = jnp.maximum(bias + x, 0.0)
    assert out.shape == (batch, chans, bias_shape)
    assert jnp.allclose(out, ref, atol=1e-6), "mismatch vs reference"

    print("KERNEL_OK")
</pallas_src>

<mosaic_0001>
module attributes {stable_mosaic.version = 11 : i64} {
  func.func @_b1relu_kernel(%arg0: i32, %arg1: memref<4x512xf32, #tpu.memory_space<vmem>>, %arg2: memref<1x512xf32, #tpu.memory_space<vmem>>, %arg3: memref<4x512xf32, #tpu.memory_space<vmem>>) attributes {dimension_semantics = [#tpu.dimension_semantics<parallel>], iteration_bounds = array<i64: 1>, scalar_prefetch = 0 : i64, scratch_operands = 0 : i64, tpu.core_type = #tpu.core_type<tc>, window_params = [{transform_indices = @transform_0, window_bounds = array<i64: 4, 512>}, {pipeline_mode = #tpu.pipeline_mode<synchronous>, transform_indices = @transform_1, window_bounds = array<i64: 1, 512>}, {transform_indices = @transform_2, window_bounds = array<i64: 4, 512>}]} {
    %c0 = arith.constant 0 : index
    %c0_0 = arith.constant 0 : index
    %0 = vector.load %arg1[%c0, %c0_0] : memref<4x512xf32, #tpu.memory_space<vmem>>, vector<4x512xf32>
    %c0_1 = arith.constant 0 : index
    %c0_2 = arith.constant 0 : index
    %1 = vector.load %arg2[%c0_1, %c0_2] : memref<1x512xf32, #tpu.memory_space<vmem>>, vector<1x512xf32>
    %2 = vector.broadcast %1 : vector<1x512xf32> to vector<4x512xf32>
    %3 = arith.addf %0, %2 : vector<4x512xf32>
    %cst = arith.constant 0.000000e+00 : f32
    %4 = vector.broadcast %cst : f32 to vector<4x512xf32>
    %5 = arith.maximumf %3, %4 : vector<4x512xf32>
    %c0_3 = arith.constant 0 : index
    %c0_4 = arith.constant 0 : index
    %6 = vector.load %arg3[%c0_3, %c0_4] : memref<4x512xf32, #tpu.memory_space<vmem>>, vector<4x512xf32>
    tpu.vector_store %arg3[%c0_3, %c0_4], %5 {strides = array<i32>} : memref<4x512xf32, #tpu.memory_space<vmem>>, vector<4x512xf32>,
    return
  }
  func.func @transform_0(%arg0: i32) -> (i32, i32) {
    %c0_i32 = arith.constant 0 : i32
    %c0_i32_0 = arith.constant 0 : i32
    return %arg0, %c0_i32 : i32, i32
  }
  func.func @transform_1(%arg0: i32) -> (i32, i32) {
    %c0_i32 = arith.constant 0 : i32
    %c0_i32_0 = arith.constant 0 : i32
    %c0_i32_1 = arith.constant 0 : i32
    return %c0_i32, %c0_i32_0 : i32, i32
  }
  func.func @transform_2(%arg0: i32) -> (i32, i32) {
    %c0_i32 = arith.constant 0 : i32
    %c0_i32_0 = arith.constant 0 : i32
    return %arg0, %c0_i32 : i32, i32
  }
}

</mosaic_0001>

<bundles_post_ra>
// kernel: tpu_custom_call.1
= control target key start
LH: loop header
LB: loop body
LE: loop exit
PB: predicated region body
PF: predicated region fallthrough
CT: control target
= control target key end

     0   :  { %7 = vsyncpa [#allocation3], 0  ;;  %s211_s0 = inlined_call_operand.hbm [shape: f32[4,512], index: 0, kind: input, shape index: {}]   ;;  %s212_s1 = inlined_call_operand.hbm [shape: f32[1,512], index: 1, kind: input, shape index: {}]   ;;  %s213_s2 = inlined_call_operand.hbm [shape: f32[4,512], index: 2, kind: output, shape index: {}]  }
   0x1   :  { %8 = vsyncpa [#allocation6], 0 }
   0x2   :  { %9 = vsyncpa [#allocation4], 0  ;;  %s157_s9 = smov [#allocation2]   ;;  %s158_s11 = smov [#allocation5]  }
   0x3   :  { %s16_s10 = sshll.u32 %s157_s9, 4  ;;  %s26_s12 = sshll.u32 %s158_s11, 4  ;;  %s17_s10 = int_to_ptr.vmem [resolvable:$true] %s16_s10  ;;  %s27_s12 = int_to_ptr.vmem [resolvable:$true] %s26_s12 }
   0x4   :  { %s85_s15 = scalar_lea.hbm %s211_s0, 256 }
   0x5   :  { %p86_p0 = scmp.ne.s32.totalorder %s211_s0, %s85_s15  ;;  %p89_p1 = scmp.lt.u32.totalorder %s85_s15, %s211_s0 }
   0x7   :  { %p91_p2 = pnand %p89_p1, %p86_p0 }
   0x9   :  { %94 = shalt.err (!%p91_p2)
}
   0xa   :  { %s95_s20 = scalar_lea.vmem %s17_s10, 256  ;;  %p100_p4 = scmp.lt.s32.totalorder %s17_s10, %s17_s10 }
   0xb   :  { %p96_p3 = scmp.ne.s32.totalorder %s17_s10, %s95_s20  ;;  %p101_p5 = scmp.lt.s32.totalorder %s95_s20, %s95_s20 }
   0xd   :  { %p102_p6 = por %p101_p5, %p100_p4 }
   0xf   :  { %p103_p7 = pnand %p102_p6, %p96_p3 }
  0x11   :  { %106 = shalt.err (!%p103_p7)
}
  0x12   :  { %19 = dma.hbm_to_vmem [thread:$0]  %s211_s0, 256, %s17_s10, [#allocation3]  }
  0x13   :  { %s107_s25 = scalar_lea.hbm %s212_s1, 64 }
  0x14   :  { %p108_p8 = scmp.ne.s32.totalorder %s212_s1, %s107_s25  ;;  %p111_p9 = scmp.lt.u32.totalorder %s107_s25, %s212_s1 }
  0x16   :  { %p113_p10 = pnand %p111_p9, %p108_p8 }
  0x18   :  { %116 = shalt.err (!%p113_p10)
}
  0x19   :  { %s117_s30 = scalar_lea.vmem %s27_s12, 64  ;;  %p122_p12 = scmp.lt.s32.totalorder %s27_s12, %s27_s12 }
  0x1a   :  { %p118_p11 = scmp.ne.s32.totalorder %s27_s12, %s117_s30  ;;  %p123_p13 = scmp.lt.s32.totalorder %s117_s30, %s117_s30 }
  0x1c   :  { %p124_p0 = por %p123_p13, %p122_p12 }
  0x1e   :  { %p125_p1 = pnand %p124_p0, %p118_p11 }
  0x20   :  { %128 = shalt.err (!%p125_p1)
}
  0x21   :  { %29 = dma.hbm_to_vmem [thread:$0]  %s212_s1, 64, %s27_s12, [#allocation6]  }
  0x22   :  { %151 = dma.done.wait [#allocation3], 256  }
  0x23   :  { %152 = vsyncadd [#allocation3], 4294967040 }
  0x24   :  { %153 = dma.done.wait [#allocation6], 64  }
  0x25   :  { %154 = vsyncadd [#allocation6], 4294967232  ;;  %v40_v0 = vlaneseq  ;;  %v38_v6 = vld [vmem:[#allocation5] sm:$0xf]  ;;  %v36_v11 = vld [vmem:[#allocation2] sm:$0xff]  ;;  %s159_s1 = smov [#allocation7]  }
  0x26   :  { %v37_v12 = vld [vmem:[#allocation2 + $0x8] sm:$0xff]  ;;  %s72_s4 = sshll.u32 %s159_s1, 4  ;;  %s73_s4 = int_to_ptr.vmem [resolvable:$true] %s72_s4 }
  0x27   :  { %v41_v1 = vshrl.u32 %v40_v0, 7  ;;  %s129_s5 = scalar_lea.vmem %s73_s4, 256  ;;  %p134_p3 = scmp.lt.s32.totalorder %s73_s4, %s73_s4 }
  0x28   :  { %p130_p2 = scmp.ne.s32.totalorder %s73_s4, %s129_s5  ;;  %p135_p4 = scmp.lt.s32.totalorder %s129_s5, %s129_s5 }
  0x29   :  { %v42_v2 = vsub.s32 0, %v41_v1  ;;  %v46_v3 = vsub.s32 1, %v41_v1  ;;  %v50_v4 = vsub.s32 2, %v41_v1  ;;  %v54_v5 = vsub.s32 3, %v41_v1 }
  0x2a   :  { %p136_p5 = por %p135_p4, %p134_p3 }
  0x2b   :  { %v43_v7 = vrot.slane %v38_v6, %v42_v2  ;;  %v47_v8 = vrot.slane %v38_v6, %v46_v3  ;;  %v51_v9 = vrot.slane %v38_v6, %v50_v4  ;;  %v55_v10 = vrot.slane %v38_v6, %v54_v5 }
  0x2c   :  { %p137_p6 = pnand %p136_p5, %p130_p2 }
  0x2d   :  { %v56_v13 = vcombine.low %v43_v7, %v47_v8  ;;  %v57_v14 = vcombine.low %v51_v9, %v55_v10 }
  0x2f   :  { %v60_v15 = vadd.f32 %v56_v13, %v36_v11  ;;  %v61_v16 = vadd.f32 %v57_v14, %v37_v12 }
  0x31   :  { %v62_v17 = vmax.f32 %v60_v15, 0.0  ;;  %v63_v18 = vmax.f32 %v61_v16, 0.0 }
  0x33   :  { %64 = vst [vmem:[#allocation7] sm:$0xff] %v62_v17  ;;  %65 = vst [vmem:[#allocation7 + $0x8] sm:$0xff] %v63_v18 }
  0x34   :  { %140 = shalt.err (!%p137_p6)
}
  0x35   :  { %s141_s8 = scalar_lea.hbm %s213_s2, 256 }
  0x36   :  { %p142_p7 = scmp.ne.s32.totalorder %s213_s2, %s141_s8  ;;  %p145_p8 = scmp.lt.u32.totalorder %s141_s8, %s213_s2 }
  0x38   :  { %p147_p9 = pnand %p145_p8, %p142_p7 }
  0x3a   :  { %150 = shalt.err (!%p147_p9)
}
  0x3b   :  { %75 = dma.vmem_to_hbm [thread:$0]  %s73_s4, 256, %s213_s2, [#allocation4]  }
  0x3c   :  { %155 = dma.done.wait [#allocation4], 256  }
  0x3d   :  { %156 = vsyncadd [#allocation4], 4294967040 }
  0x3e   :  { %79 = vsyncpa [#allocation3], 1 }
  0x3f   :  { %80 = vsyncpa [#allocation6], 1 }
  0x40   :  { %81 = vsyncpa [#allocation4], 1 }

</bundles_post_ra>
